<compile_context>
chip_gen: v6e
topology: v6e:2x2x1
jax: 0.10.0
libtpu: 0.0.40
codegen_flags: <defaults>
</compile_context>

<pallas_src>
import math

import jax
import jax.numpy as jnp
from jax.experimental import pallas as pl
from jax.experimental.pallas import tpu as pltpu

# Module hyper-parameters (OCSoftmax defaults).
FEAT_DIM = 2
M_REAL = 0.5
M_FAKE = 0.2
ALPHA = 20.0
EPS = 1e-12  # F.normalize eps


def _round_up(n, m):
    return ((n + m - 1) // m) * m


def _ocsoftmax_kernel(nb_ref, w_ref, x_ref, lab_ref, scores_ref, part_ref):
    i = pl.program_id(0)
    D = x_ref.shape[0]
    rows_blk = lab_ref.shape[0]

    # Folded normalization:
    #   scores = (w_norm . x) * rsqrt(max(|x|^2, eps^2))
    # which equals F.normalize(x) @ F.normalize(center).T  (center already
    # normalized in the wrapper, its components read as SMEM scalars).
    dot_cx = jnp.zeros((rows_blk, 128), jnp.float32)
    x_sumsq = jnp.zeros((rows_blk, 128), jnp.float32)
    for d in range(D):                      # D=2: static unroll, pure VPU FMAs (no MXU)
        xd = x_ref[d]                       # (rows_blk, 128)
        dot_cx = dot_cx + w_ref[d] * xd
        x_sumsq = x_sumsq + xd * xd
    inv_x = jax.lax.rsqrt(jnp.maximum(x_sumsq, EPS * EPS))   # EUP slot
    scores = dot_cx * inv_x                                  # (rows_blk, 128)

    # output_scores = scores.clone()  (dense (8,128)-tiled store)
    scores_ref[...] = scores

    # scores[labels == 0] = m_real - scores[labels == 0]
    # scores[labels == 1] = scores[labels == 1] - m_fake
    lab = lab_ref[...].astype(jnp.int32)
    adj = jnp.where(lab == 0, M_REAL - scores, scores)
    adj = jnp.where(lab == 1, adj - M_FAKE, adj)

    # Numerically stable softplus(alpha * scores), f32 throughout.
    z = ALPHA * adj
    sp = jnp.maximum(z, 0.0) + jnp.log1p(jnp.exp(-jnp.abs(z)))

    # Mask batch padding out of the sum (true B read from SMEM).
    row = jax.lax.broadcasted_iota(jnp.int32, (rows_blk, 128), 0)
    lane = jax.lax.broadcasted_iota(jnp.int32, (rows_blk, 128), 1)
    pos = (i * rows_blk + row) * 128 + lane
    sp = jnp.where(pos < nb_ref[0], sp, 0.0)

    # Per-block partial sum folded to one dense (8,128) tile (tile-aligned
    # reshape + vreg adds only); final cross-lane reduce + 1/B happen outside.
    part_ref[...] = jnp.sum(sp.reshape(-1, 8, 128), axis=0, keepdims=True)


def ocsoftmax_forward(x, labels, center, *, max_block_rows=2048):
    """x: (B, D) float32, labels: (B,) int, center: (1, D) float32."""
    B, D = x.shape

    # Rows of 128 lanes needed for the batch; balance them across blocks so the
    # tail over-pad is at most ~31 rows instead of (block-1) rows.
    rows = -(-B // 128)
    n_blocks = max(1, -(-rows // max_block_rows))
    rows_blk = _round_up(-(-rows // n_blocks), 32)   # 32: f32 (8,128) + int8 (32,128) tiling
    rows_pad = n_blocks * rows_blk
    b_pad = rows_pad * 128

    # Layout plumbing: (B, D) -> (D, rows_pad, 128) planes; labels -> int8 tiles.
    xt = jnp.pad(jnp.transpose(x.astype(jnp.float32)), ((0, 0), (0, b_pad - B)))
    xt = xt.reshape(D, rows_pad, 128)
    lab = jnp.pad(labels.astype(jnp.int8), (0, b_pad - B)).reshape(rows_pad, 128)

    # Pre-normalized center (F.normalize: c / max(||c||, eps)) -> SMEM scalars.
    c = center.astype(jnp.float32).reshape(-1)
    w = c * jax.lax.rsqrt(jnp.maximum(jnp.sum(c * c), EPS * EPS))
    nb = jnp.array([B], dtype=jnp.int32)

    scores, partials = pl.pallas_call(
        _ocsoftmax_kernel,
        out_shape=(
            jax.ShapeDtypeStruct((rows_pad, 128), jnp.float32),
            jax.ShapeDtypeStruct((n_blocks, 8, 128), jnp.float32),
        ),
        grid_spec=pltpu.PrefetchScalarGridSpec(
            num_scalar_prefetch=0,
            grid=(n_blocks,),
            in_specs=[
                pl.BlockSpec(memory_space=pltpu.MemorySpace.SMEM),      # B   (1,)
                pl.BlockSpec(memory_space=pltpu.MemorySpace.SMEM),      # w   (D,)
                pl.BlockSpec((D, rows_blk, 128), lambda i: (0, i, 0)),  # x planes
                pl.BlockSpec((rows_blk, 128), lambda i: (i, 0)),        # labels
            ],
            out_specs=(
                pl.BlockSpec((rows_blk, 128), lambda i: (i, 0)),        # scores
                pl.BlockSpec((1, 8, 128), lambda i: (i, 0, 0)),         # partial sums
            ),
        ),
        compiler_params=pltpu.CompilerParams(
            # Blocks are fully independent (per-block partial sums, no resident
            # accumulator) -> "parallel" enables megacore sharding on v7x.
            dimension_semantics=("parallel",),
            vmem_limit_bytes=32 * 1024 * 1024,
        ),
    )(nb, w, xt, lab)

    loss = jnp.sum(partials) * (1.0 / B)     # mean over the true batch
    return loss, scores.reshape(-1)[:B]      # scalar loss, (B,) output_scores


def init_center(key, feat_dim=FEAT_DIM):
    # Deterministic synthetic init mirroring nn.init.kaiming_uniform_(a=0.25)
    # on a (1, feat_dim) parameter: fan_in = feat_dim.
    a = 0.25
    gain = math.sqrt(2.0 / (1.0 + a * a))
    bound = gain * math.sqrt(3.0 / feat_dim)
    return jax.random.uniform(
        key, (1, feat_dim), dtype=jnp.float32, minval=-bound, maxval=bound
    )


def _ocsoftmax_ref(x, labels, center):
    w = center / jnp.maximum(jnp.linalg.norm(center, axis=1, keepdims=True), EPS)
    xn = x / jnp.maximum(jnp.linalg.norm(x, axis=1, keepdims=True), EPS)
    s = xn @ w.T                                   # (B, 1)
    adj = jnp.where(labels[:, None] == 0, M_REAL - s, s)
    adj = jnp.where(labels[:, None] == 1, adj - M_FAKE, adj)
    loss = jnp.mean(jax.nn.softplus(ALPHA * adj))
    return loss, s[:, 0]


if __name__ == "__main__":
    key = jax.random.PRNGKey(0)
    k_x, k_c, k_l, k_x2, k_l2 = jax.random.split(key, 5)

    center = init_center(k_c)

    # Small case (B=8): single grid step, padded tiles masked out of the loss.
    batch = 8
    x = jax.random.normal(k_x, (batch, FEAT_DIM), dtype=jnp.float32)
    labels = jax.random.bernoulli(k_l, 0.5, (batch,)).astype(jnp.int32)

    loss, scores = ocsoftmax_forward(x, labels, center)
    jax.block_until_ready((loss, scores))

    loss_r, scores_r = _ocsoftmax_ref(x, labels, center)
    assert scores.shape == (batch,)
    assert jnp.allclose(scores, scores_r, atol=1e-5), "scores mismatch (B=8)"
    assert jnp.allclose(loss, loss_r, atol=1e-5), "loss mismatch (B=8)"

    # Multi-block case (B=4099, max_block_rows=32): 2 independent grid steps,
    # exercises per-block partial loss sums, parallel semantics, ragged tail.
    batch2 = 4099
    x2 = jax.random.normal(k_x2, (batch2, FEAT_DIM), dtype=jnp.float32)
    labels2 = jax.random.bernoulli(k_l2, 0.5, (batch2,)).astype(jnp.int32)

    loss2, scores2 = ocsoftmax_forward(x2, labels2, center, max_block_rows=32)
    jax.block_until_ready((loss2, scores2))

    loss2_r, scores2_r = _ocsoftmax_ref(x2, labels2, center)
    assert jnp.allclose(scores2, scores2_r, atol=1e-5), "scores mismatch (B=4099)"
    assert jnp.allclose(loss2, loss2_r, atol=1e-5), "loss mismatch (B=4099)"

    print("KERNEL_OK")
</pallas_src>

<mosaic_0001>
module attributes {stable_mosaic.version = 11 : i64} {
  func.func @_ocsoftmax_kernel(%arg0: i32, %arg1: memref<1xi32, #tpu.memory_space<smem>>, %arg2: memref<2xf32, #tpu.memory_space<smem>>, %arg3: memref<2x32x128xf32, #tpu.memory_space<vmem>>, %arg4: memref<32x128xi8, #tpu.memory_space<vmem>>, %arg5: memref<32x128xf32, #tpu.memory_space<vmem>>, %arg6: memref<1x8x128xf32, #tpu.memory_space<vmem>>) attributes {dimension_semantics = [#tpu.dimension_semantics<parallel>], iteration_bounds = array<i64: 1>, scalar_prefetch = 0 : i64, scratch_operands = 0 : i64, tpu.core_type = #tpu.core_type<tc>, window_params = [{transform_indices = @transform_0, window_bounds = array<i64: 1>}, {transform_indices = @transform_1, window_bounds = array<i64: 2>}, {transform_indices = @transform_2, window_bounds = array<i64: 2, 32, 128>}, {transform_indices = @transform_3, window_bounds = array<i64: 32, 128>}, {transform_indices = @transform_4, window_bounds = array<i64: 32, 128>}, {transform_indices = @transform_5, window_bounds = array<i64: 1, 8, 128>}]} {
    %cst = arith.constant 0.000000e+00 : f32
    %0 = vector.broadcast %cst : f32 to vector<32x128xf32>
    %cst_0 = arith.constant 0.000000e+00 : f32
    %1 = vector.broadcast %cst_0 : f32 to vector<32x128xf32>
    %c0 = arith.constant 0 : index
    %c0_1 = arith.constant 0 : index
    %c0_2 = arith.constant 0 : index
    %2 = vector.load %arg3[%c0, %c0_1, %c0_2] : memref<2x32x128xf32, #tpu.memory_space<vmem>>, vector<1x32x128xf32>
    %3 = vector.shape_cast %2 : vector<1x32x128xf32> to vector<32x128xf32>
    %c0_3 = arith.constant 0 : index
    %4 = memref.load %arg2[%c0_3] : memref<2xf32, #tpu.memory_space<smem>>
    %5 = vector.broadcast %4 : f32 to vector<32x128xf32>
    %6 = arith.mulf %5, %3 : vector<32x128xf32>
    %7 = arith.addf %0, %6 : vector<32x128xf32>
    %8 = arith.mulf %3, %3 : vector<32x128xf32>
    %9 = arith.addf %1, %8 : vector<32x128xf32>
    %c1 = arith.constant 1 : index
    %c0_4 = arith.constant 0 : index
    %c0_5 = arith.constant 0 : index
    %10 = vector.load %arg3[%c1, %c0_4, %c0_5] : memref<2x32x128xf32, #tpu.memory_space<vmem>>, vector<1x32x128xf32>
    %11 = vector.shape_cast %10 : vector<1x32x128xf32> to vector<32x128xf32>
    %c1_6 = arith.constant 1 : index
    %12 = memref.load %arg2[%c1_6] : memref<2xf32, #tpu.memory_space<smem>>
    %13 = vector.broadcast %12 : f32 to vector<32x128xf32>
    %14 = arith.mulf %13, %11 : vector<32x128xf32>
    %15 = arith.addf %7, %14 : vector<32x128xf32>
    %16 = arith.mulf %11, %11 : vector<32x128xf32>
    %17 = arith.addf %9, %16 : vector<32x128xf32>
    %cst_7 = arith.constant 1.000000e-24 : f32
    %18 = vector.broadcast %cst_7 : f32 to vector<32x128xf32>
    %19 = arith.maximumf %17, %18 : vector<32x128xf32>
    %20 = math.rsqrt %19 : vector<32x128xf32>
    %21 = arith.mulf %15, %20 : vector<32x128xf32>
    %c0_8 = arith.constant 0 : index
    %c0_9 = arith.constant 0 : index
    %22 = vector.load %arg5[%c0_8, %c0_9] : memref<32x128xf32, #tpu.memory_space<vmem>>, vector<32x128xf32>
    tpu.vector_store %arg5[%c0_8, %c0_9], %21 {strides = array<i32>} : memref<32x128xf32, #tpu.memory_space<vmem>>, vector<32x128xf32>,
    %c0_10 = arith.constant 0 : index
    %c0_11 = arith.constant 0 : index
    %23 = vector.load %arg4[%c0_10, %c0_11] : memref<32x128xi8, #tpu.memory_space<vmem>>, vector<32x128xi8>
    %24 = arith.extsi %23 : vector<32x128xi8> to vector<32x128xi32>
    %c0_i32 = arith.constant 0 : i32
    %25 = vector.broadcast %c0_i32 : i32 to vector<32x128xi32>
    %26 = arith.cmpi eq, %24, %25 : vector<32x128xi32>
    %cst_12 = arith.constant 5.000000e-01 : f32
    %27 = vector.broadcast %cst_12 : f32 to vector<32x128xf32>
    %28 = arith.subf %27, %21 : vector<32x128xf32>
    %29 = arith.select %26, %28, %21 : vector<32x128xi1>, vector<32x128xf32>
    %c1_i32 = arith.constant 1 : i32
    %30 = vector.broadcast %c1_i32 : i32 to vector<32x128xi32>
    %31 = arith.cmpi eq, %24, %30 : vector<32x128xi32>
    %cst_13 = arith.constant 2.000000e-01 : f32
    %32 = vector.broadcast %cst_13 : f32 to vector<32x128xf32>
    %33 = arith.subf %29, %32 : vector<32x128xf32>
    %34 = arith.select %31, %33, %29 : vector<32x128xi1>, vector<32x128xf32>
    %cst_14 = arith.constant 2.000000e+01 : f32
    %35 = vector.broadcast %cst_14 : f32 to vector<32x128xf32>
    %36 = arith.mulf %35, %34 : vector<32x128xf32>
    %cst_15 = arith.constant 0.000000e+00 : f32
    %37 = vector.broadcast %cst_15 : f32 to vector<32x128xf32>
    %38 = arith.maximumf %36, %37 : vector<32x128xf32>
    %39 = math.absf %36 : vector<32x128xf32>
    %cst_16 = arith.constant 0.000000e+00 : f32
    %40 = vector.broadcast %cst_16 : f32 to vector<32x128xf32>
    %41 = arith.subf %40, %39 : vector<32x128xf32>
    %42 = math.exp %41 : vector<32x128xf32>
    %43 = math.log1p %42 : vector<32x128xf32>
    %44 = arith.addf %38, %43 : vector<32x128xf32>
    %45 = tpu.iota {dimensions = array<i32: 0>} : vector<32x128xi32>
    %46 = tpu.iota {dimensions = array<i32: 1>} : vector<32x128xi32>
    %c32_i32 = arith.constant 32 : i32
    %47 = arith.muli %arg0, %c32_i32 : i32
    %48 = vector.broadcast %47 : i32 to vector<32x128xi32>
    %49 = arith.addi %48, %45 : vector<32x128xi32>
    %c128_i32 = arith.constant 128 : i32
    %50 = vector.broadcast %c128_i32 : i32 to vector<32x128xi32>
    %51 = arith.muli %49, %50 : vector<32x128xi32>
    %52 = arith.addi %51, %46 : vector<32x128xi32>
    %c0_17 = arith.constant 0 : index
    %53 = memref.load %arg1[%c0_17] : memref<1xi32, #tpu.memory_space<smem>>
    %54 = vector.broadcast %53 : i32 to vector<32x128xi32>
    %55 = arith.cmpi slt, %52, %54 : vector<32x128xi32>
    %cst_18 = arith.constant 0.000000e+00 : f32
    %56 = vector.broadcast %cst_18 : f32 to vector<32x128xf32>
    %57 = arith.select %55, %44, %56 : vector<32x128xi1>, vector<32x128xf32>
    %58 = vector.shape_cast %57 : vector<32x128xf32> to vector<4x8x128xf32>
    %cst_19 = arith.constant dense<0.000000e+00> : vector<8x128xf32>
    %59 = vector.multi_reduction <add>, %58, %cst_19 [0] : vector<4x8x128xf32> to vector<8x128xf32>
    %60 = vector.shape_cast %59 : vector<8x128xf32> to vector<1x8x128xf32>
    %c0_20 = arith.constant 0 : index
    %c0_21 = arith.constant 0 : index
    %c0_22 = arith.constant 0 : index
    %61 = vector.load %arg6[%c0_20, %c0_21, %c0_22] : memref<1x8x128xf32, #tpu.memory_space<vmem>>, vector<1x8x128xf32>
    tpu.vector_store %arg6[%c0_20, %c0_21, %c0_22], %60 {strides = array<i32>} : memref<1x8x128xf32, #tpu.memory_space<vmem>>, vector<1x8x128xf32>,
    return
  }
  func.func @transform_0(%arg0: i32) -> i32 {
    %c0_i32 = arith.constant 0 : i32
    %c0_i32_0 = arith.constant 0 : i32
    return %c0_i32 : i32
  }
  func.func @transform_1(%arg0: i32) -> i32 {
    %c0_i32 = arith.constant 0 : i32
    %c0_i32_0 = arith.constant 0 : i32
    return %c0_i32 : i32
  }
  func.func @transform_2(%arg0: i32) -> (i32, i32, i32) {
    %c0_i32 = arith.constant 0 : i32
    %c0_i32_0 = arith.constant 0 : i32
    %c0_i32_1 = arith.constant 0 : i32
    return %c0_i32, %arg0, %c0_i32_0 : i32, i32, i32
  }
  func.func @transform_3(%arg0: i32) -> (i32, i32) {
    %c0_i32 = arith.constant 0 : i32
    %c0_i32_0 = arith.constant 0 : i32
    return %arg0, %c0_i32 : i32, i32
  }
  func.func @transform_4(%arg0: i32) -> (i32, i32) {
    %c0_i32 = arith.constant 0 : i32
    %c0_i32_0 = arith.constant 0 : i32
    return %arg0, %c0_i32 : i32, i32
  }
  func.func @transform_5(%arg0: i32) -> (i32, i32, i32) {
    %c0_i32 = arith.constant 0 : i32
    %c0_i32_0 = arith.constant 0 : i32
    %c0_i32_1 = arith.constant 0 : i32
    return %arg0, %c0_i32, %c0_i32_0 : i32, i32, i32
  }
}

</mosaic_0001>

<bundles_post_ra>
// kernel: tpu_custom_call.1
= control target key start
LH: loop header
LB: loop body
LE: loop exit
PB: predicated region body
PF: predicated region fallthrough
CT: control target
= control target key end

     0   :  { %12 = vsyncpa [#allocation6], 0  ;;  %s529_s0 = inlined_call_operand.<no memory space> [shape: s32[1], index: 0, kind: input, shape index: {}]   ;;  %s530_s1 = inlined_call_operand.vmem [shape: f32[2], index: 1, kind: input, shape index: {}]   ;;  %s531_s2 = inlined_call_operand.hbm [shape: f32[2,32,128], index: 2, kind: input, shape index: {}]   ;;  %s532_s3 = inlined_call_operand.hbm [shape: s8[32,128], index: 3, kind: input, shape index: {}]   ;;  %s533_s4 = inlined_call_operand.hbm [shape: f32[32,128], index: 4, kind: output, shape index: {0}]   ;;  %s534_s5 = inlined_call_operand.hbm [shape: f32[1,8,128], index: 5, kind: output, shape index: {1}]  }
   0x1   :  { %13 = vsyncpa [#allocation4], 0 }
   0x2   :  { %14 = vsyncpa [#allocation9], 0 }
   0x3   :  { %15 = vsyncpa [#allocation5], 0 }
   0x4   :  { %16 = vsyncpa [#allocation12], 0  ;;  %s25_s20 = sshll.u32 %s530_s1, 4  ;;  %s26_s20 = int_to_ptr.vmem [resolvable:$true] %s25_s20 }
   0x5   :  { %s319_s21 = scalar_lea.vmem %s26_s20, 16  ;;  %p324_p1 = scmp.lt.s32.totalorder %s26_s20, %s26_s20 }
   0x6   :  { %p320_p0 = scmp.ne.s32.totalorder %s26_s20, %s319_s21  ;;  %p325_p2 = scmp.lt.s32.totalorder %s319_s21, %s319_s21 }
   0x8   :  { %p326_p3 = por %p325_p2, %p324_p1 }
   0xa   :  { %p327_p4 = pnand %p326_p3, %p320_p0 }
   0xc   :  { %330 = shalt.err (!%p327_p4)
}
   0xd   :  { %s421_s22 = smov [#allocation3]   ;;  %s422_s23 = smov [#allocation7]  }
   0xe   :  { %28 = dma.vmem_to_smem %s26_s20, 16, %s421_s22, [#allocation6]  }
   0xf   :  { %s34_s24 = sshll.u32 %s422_s23, 4  ;;  %s35_s24 = int_to_ptr.vmem [resolvable:$true] %s34_s24 }
  0x10   :  { %s339_s25 = scalar_lea.vmem %s35_s24, 1024  ;;  %p344_p6 = scmp.lt.s32.totalorder %s35_s24, %s35_s24 }
  0x11   :  { %p340_p5 = scmp.ne.s32.totalorder %s35_s24, %s339_s25  ;;  %p345_p7 = scmp.lt.s32.totalorder %s339_s25, %s339_s25 }
  0x13   :  { %p346_p8 = por %p345_p7, %p344_p6 }
  0x15   :  { %p347_p9 = pnand %p346_p8, %p340_p5 }
  0x17   :  { %350 = shalt.err (!%p347_p9)
}
  0x18   :  { %s423_s1 = smov 128   ;;  %s424_s26 = smov 8  }
  0x19   :  { %40 = dma.hbm_to_vmem [thread:$0]  %s531_s2, 1024, %s35_s24, [#allocation4], %s423_s1, %s423_s1, %s424_s26  }
  0x1a   :  { %s425_s29 = smov [#allocation8]  }
  0x1b   :  { %s47_s30 = sshll.u32 %s425_s29, 4  ;;  %s48_s30 = int_to_ptr.vmem [resolvable:$true] %s47_s30 }
  0x1c   :  { %s359_s6 = scalar_lea.vmem %s48_s30, 128  ;;  %p364_p11 = scmp.lt.s32.totalorder %s48_s30, %s48_s30 }
  0x1d   :  { %p360_p10 = scmp.ne.s32.totalorder %s48_s30, %s359_s6  ;;  %p365_p12 = scmp.lt.s32.totalorder %s359_s6, %s359_s6 }
  0x1f   :  { %p366_p13 = por %p365_p12, %p364_p11 }
  0x21   :  { %p367_p0 = pnand %p366_p13, %p360_p10 }
  0x23   :  { %370 = shalt.err (!%p367_p0)
}
  0x24   :  { %50 = dma.hbm_to_vmem [thread:$0]  %s532_s3, 128, %s48_s30, [#allocation9]  }
  0x25   :  { %411 = dma.done.wait [#allocation6], 16  }
  0x26   :  { %412 = vsyncadd [#allocation6], 4294967280 }
  0x27   :  { %413 = dma.done.wait [#allocation4], 1024  }
  0x28   :  { %414 = vsyncadd [#allocation4], 4294966272 }
  0x29   :  { %415 = dma.done.wait [#allocation9], 128  }
  0x2a   :  { %416 = vsyncadd [#allocation9], 4294967168 }
  0x2b   :  { %60 = sfence }
  0x2c   :  { %v61_v0 = vld [vmem:[#allocation7] sm:$0xff]  ;;  %s65_s2 = sld [smem:[#allocation3]]  ;;  %v62_v4 = vld [vmem:[#allocation7 + $0x8] sm:$0xff]  ;;  %v63_v6 = vld [vmem:[#allocation7 + $0x10] sm:$0xff]  ;;  %s426_s3 = smov [#allocation10]  }
  0x2d   :  { %v84_v1 = vld [vmem:[#allocation7 + $0x20] sm:$0xff]  ;;  %v75_v2 = vmul.f32 %v61_v0, %v61_v0  ;;  %v85_v5 = vld [vmem:[#allocation7 + $0x28] sm:$0xff]  ;;  %s283_s9 = sld [smem:[#allocation3 + $0x1]]  ;;  %v76_v7 = vmul.f32 %v62_v4, %v62_v4  ;;  %v77_v9 = vmul.f32 %v63_v6, %v63_v6  ;;  %v86_v10 = vld [vmem:[#allocation7 + $0x30] sm:$0xff]  ;;  %s255_s10 = sshll.u32 %s426_s3, 4  ;;  %s256_s10 = int_to_ptr.vmem [resolvable:$true] %s255_s10 }
  0x2e   :  { %v98_v3 = vmul.f32 %v84_v1, %v84_v1  ;;  %v99_v8 = vmul.f32 %v85_v5, %v85_v5  ;;  %v64_v12 = vld [vmem:[#allocation7 + $0x18] sm:$0xff]  ;;  %v100_v15 = vmul.f32 %v86_v10, %v86_v10  ;;  %v122_v30 = vld [vmem:[#allocation8] sm:$0xff]  ;;  %s371_s11 = scalar_lea.vmem %s256_s10, 512  ;;  %p376_p2 = scmp.lt.s32.totalorder %s256_s10, %s256_s10 }
  0x2f   :  { %v87_v13 = vld [vmem:[#allocation7 + $0x38] sm:$0xff]  ;;  %v78_v19 = vmul.f32 %v64_v12, %v64_v12  ;;  %v123_v34 = vunpack.c.0.s8 %v122_v30  ;;  %v124_v36 = vunpack.c.1.s8 %v122_v30  ;;  %v125_v44 = vunpack.c.2.s8 %v122_v30  ;;  %p372_p1 = scmp.ne.s32.totalorder %s256_s10, %s371_s11  ;;  %p377_p3 = scmp.lt.s32.totalorder %s371_s11, %s371_s11 }
  0x30   :  { %v102_v11 = vadd.f32 %v98_v3, %v75_v2  ;;  %v103_v14 = vadd.f32 %v99_v8, %v76_v7  ;;  %v104_v18 = vadd.f32 %v100_v15, %v77_v9  ;;  %v101_v20 = vmul.f32 %v87_v13, %v87_v13 }
  0x31   :  { %vm127_vm0 = vcmp.eq.s32.totalorder %v123_v34, 0  ;;  %vm128_vm1 = vcmp.eq.s32.totalorder %v124_v36, 0  ;;  %vm470_vm2 = vcmp.eq.s32.totalorder %v123_v34, 1  ;;  %v126_v52 = vunpack.c.3.s8 %v122_v30  ;;  %p378_p4 = por %p377_p3, %p376_p2 }
  0x32   :  { %v106_v16 = vmax.f32 %v102_v11, 1e-24  ;;  %v107_v17 = vmax.f32 %v103_v14, 1e-24  ;;  %v108_v21 = vmax.f32 %v104_v18, 1e-24  ;;  %v66_v22 = vstv %s65_s2 }
  0x33   :  { %v89_v23 = vstv %s283_s9  ;;  %v105_v24 = vadd.f32 %v101_v20, %v78_v19  ;;  %v67_v26 = vmul.f32 %v66_v22, %v61_v0  ;;  %v68_v28 = vmul.f32 %v66_v22, %v62_v4  ;;  %p379_p5 = pnand %p378_p4, %p372_p1 }
  0x34   :  { %295 = vrsqrt.f32 %v106_v16  ;;  %v90_v27 = vmul.f32 %v89_v23, %v84_v1  ;;  %v91_v29 = vmul.f32 %v89_v23, %v85_v5  ;;  %v69_v32 = vmul.f32 %v66_v22, %v63_v6 }
  0x35   :  { %297 = vrsqrt.f32 %v107_v17  ;;  %v109_v25 = vmax.f32 %v105_v24, 1e-24  ;;  %v92_v33 = vmul.f32 %v89_v23, %v86_v10  ;;  %v70_v38 = vmul.f32 %v66_v22, %v64_v12 }
  0x36   :  { %299 = vrsqrt.f32 %v108_v21  ;;  %v94_v31 = vadd.f32 %v90_v27, %v67_v26  ;;  %v95_v35 = vadd.f32 %v91_v29, %v68_v28  ;;  %v93_v39 = vmul.f32 %v89_v23, %v87_v13 }
  0x37   :  { %301 = vrsqrt.f32 %v109_v25  ;;  %v96_v42 = vadd.f32 %v92_v33, %v69_v32  ;;  %vm474_vm3 = vcmp.eq.s32.totalorder %v124_v36, 1  ;;  %vm129_vm4 = vcmp.eq.s32.totalorder %v125_v44, 0 }
  0x38   :  { %v97_v48 = vadd.f32 %v93_v39, %v70_v38  ;;  %vm480_vm5 = vcmp.eq.s32.totalorder %v125_v44, 1  ;;  %vm130_vm6 = vcmp.eq.s32.totalorder %v126_v52, 0 }
  0x41   :  { %v296_v37 = vpop.eup %295 }
  0x42   :  { %v298_v40 = vpop.eup %297  ;;  %v114_v41 = vmul.f32 %v296_v37, %v94_v31 }
  0x43   :  { %v115_v43 = vmul.f32 %v298_v40, %v95_v35  ;;  %v300_v46 = vpop.eup %299 }
  0x44   :  { %118 = vst [vmem:[#allocation10] sm:$0xff] %v114_v41  ;;  %v131_v45 = vsub.f32 0.5, %v114_v41  ;;  %v116_v51 = vmul.f32 %v300_v46, %v96_v42  ;;  %v302_v56 = vpop.eup %301 }
  0x45   :  { %119 = vst [vmem:[#allocation10 + $0x8] sm:$0xff] %v115_v43  ;;  %v132_v47 = vsub.f32 0.5, %v115_v43  ;;  %v117_v60 = vmul.f32 %v302_v56, %v97_v48 }
  0x46   :  { %v135_v49 = vsel %vm127_vm0, %v131_v45, %v114_v41  ;;  %120 = vst [vmem:[#allocation10 + $0x10] sm:$0xff] %v116_v51  ;;  %v133_v58 = vsub.f32 0.5, %v116_v51 }
  0x47   :  { %v284_v53 = vadd.f32 -0.2, %v135_v49  ;;  %v136_v54 = vsel %vm128_vm1, %v132_v47, %v115_v43  ;;  %121 = vst [vmem:[#allocation10 + $0x18] sm:$0xff] %v117_v60  ;;  %v134_v2 = vsub.f32 0.5, %v117_v60 }
  0x48   :  { %v285_v57 = vadd.f32 -0.2, %v136_v54  ;;  %v137_v63 = vsel %vm129_vm4, %v133_v58, %v116_v51 }
  0x49   :  { %v147_v59 = vsel %vm470_vm2, %v284_v53, %v135_v49  ;;  %v286_v1 = vadd.f32 -0.2, %v137_v63 }
  0x4a   :  { %v148_v62 = vsel %vm474_vm3, %v285_v57, %v136_v54  ;;  %v486_v0 = vmul.f32 20.0, %v147_v59 }
  0x4b   :  { %v488_v3 = vmul.f32 20.0, %v148_v62 }
  0x4c   :  { %v159_v4 = vand.u32 2147483647, %v486_v0 }
  0x4d   :  { %382 = shalt.err (!%p379_p5)
}
  0x4e   :  { %261 = dma.vmem_to_hbm [thread:$0]  %s256_s10, 512, %s533_s4, [#allocation5], %s423_s1, %s423_s1, %s424_s26   ;;  %v138_v5 = vsel %vm130_vm6, %v134_v2, %v117_v60  ;;  %vm142_vm7 = vcmp.eq.s32.totalorder %v126_v52, 1  ;;  %v149_v6 = vsel %vm480_vm5, %v286_v1, %v137_v63  ;;  %v160_v7 = vand.u32 2147483647, %v488_v3 }
  0x4f   :  { %v287_v8 = vadd.f32 -0.2, %v138_v5  ;;  %v500_v9 = vmul.f32 20.0, %v149_v6  ;;  %v163_v10 = vsub.f32 0.0, %v159_v4  ;;  %v215_v22 = vlaneseq }
  0x50   :  { %v164_v11 = vsub.f32 0.0, %v160_v7  ;;  %v237_v51 = vstv %s529_s0  ;;  %v155_v53 = vmax.f32 %v486_v0, 0.0  ;;  %v156_v58 = vmax.f32 %v488_v3, 0.0  ;;  %s427_s0 = smov [#allocation11]  }
  0x51   :  { %v150_v12 = vsel %vm142_vm7, %v287_v8, %v138_v5  ;;  %v161_v13 = vand.u32 2147483647, %v500_v9  ;;  %v167_v14 = vmul.f32 1.442695, %v163_v10  ;;  %v216_v27 = vshrl.u32 %v215_v22, 7  ;;  %s268_s15 = sshll.u32 %s427_s0, 4  ;;  %s269_s15 = int_to_ptr.vmem [resolvable:$true] %s268_s15 }
  0x52   :  { %v503_v15 = vmul.f32 20.0, %v150_v12  ;;  %v169_v16 = vmul.f32 1.442695, %v164_v11  ;;  %v221_v36 = vand.u32 127, %v215_v22  ;;  %v157_v6 = vmax.f32 %v500_v9, 0.0  ;;  %s391_s16 = scalar_lea.vmem %s269_s15, 128  ;;  %p396_p7 = scmp.lt.s32.totalorder %s269_s15, %s269_s15 }
  0x53   :  { %v165_v17 = vsub.f32 0.0, %v161_v13  ;;  %303 = vpow2.f32 %v167_v14  ;;  %v217_v32 = vadd.s32 8, %v216_v27  ;;  %v218_v35 = vadd.s32 16, %v216_v27  ;;  %p392_p6 = scmp.ne.s32.totalorder %s269_s15, %s391_s16  ;;  %p397_p8 = scmp.lt.s32.totalorder %s391_s16, %s391_s16 }
  0x54   :  { %v162_v18 = vand.u32 2147483647, %v503_v15  ;;  %305 = vpow2.f32 %v169_v16  ;;  %v228_v37 = vmul.u32 128, %v216_v27  ;;  %v219_v44 = vadd.s32 24, %v216_v27 }
  0x55   :  { %v171_v19 = vmul.f32 1.442695, %v165_v17  ;;  %v229_v40 = vmul.u32 128, %v217_v32  ;;  %v230_v46 = vmul.u32 128, %v218_v35  ;;  %v158_v16 = vmax.f32 %v503_v15, 0.0  ;;  %p398_p9 = por %p397_p8, %p396_p7 }
  0x56   :  { %v166_v20 = vsub.f32 0.0, %v162_v18  ;;  %v232_v47 = vadd.s32 %v228_v37, %v221_v36  ;;  %v231_v61 = vmul.u32 128, %v219_v44 }
  0x57   :  { %307 = vpow2.f32 %v171_v19  ;;  %v233_v50 = vadd.s32 %v229_v40, %v221_v36  ;;  %v234_v1 = vadd.s32 %v230_v46, %v221_v36  ;;  %p399_p10 = pnand %p398_p9, %p392_p6 }
  0x58   :  { %v173_v21 = vmul.f32 1.442695, %v166_v20  ;;  %vm238_vm10 = vcmp.lt.s32.totalorder %v232_v47, %v237_v51  ;;  %v235_v12 = vadd.s32 %v231_v61, %v221_v36 }
  0x59   :  { %vm239_vm11 = vcmp.lt.s32.totalorder %v233_v50, %v237_v51  ;;  %vm240_vm13 = vcmp.lt.s32.totalorder %v234_v1, %v237_v51 }
  0x5a   :  { %309 = vpow2.f32 %v173_v21  ;;  %vm241_vm15 = vcmp.lt.s32.totalorder %v235_v12, %v237_v51 }
  0x60   :  { %v304_v23 = vpop.eup %303 }
  0x61   :  { %v306_v24 = vpop.eup %305  ;;  %v175_v25 = vadd.f32 1.0, %v304_v23  ;;  %v178_v31 = vmul.f32 -0.5, %v304_v23  ;;  %v181_v41 = vand.u32 2147483647, %v304_v23 }
  0x62   :  { %v184_v26 = vadd.f32 1.0, %v306_v24  ;;  %v187_v33 = vmul.f32 -0.5, %v306_v24  ;;  %v190_v43 = vand.u32 2147483647, %v306_v24 }
  0x63   :  { %311 = vlog2.f32 %v175_v25  ;;  %v179_v38 = vadd.f32 1.0, %v178_v31  ;;  %vm510_vm8 = vcmp.lt.f32.partialorder %v181_v41, 0.0004427343 }
  0x64   :  { %v308_v28 = vpop.eup %307  ;;  %313 = vlog2.f32 %v184_v26  ;;  %v188_v42 = vadd.f32 1.0, %v187_v33  ;;  %vm515_vm9 = vcmp.lt.f32.partialorder %v190_v43, 0.0004427343 }
  0x65   :  { %v193_v29 = vadd.f32 1.0, %v308_v28  ;;  %v196_v39 = vmul.f32 -0.5, %v308_v28  ;;  %v180_v48 = vmul.f32 %v304_v23, %v179_v38  ;;  %v199_v56 = vand.u32 2147483647, %v308_v28 }
  0x66   :  { %v189_v55 = vmul.f32 %v306_v24, %v188_v42 }
  0x67   :  { %v310_v30 = vpop.eup %309  ;;  %315 = vlog2.f32 %v193_v29  ;;  %v197_v49 = vadd.f32 1.0, %v196_v39  ;;  %vm200_vm12 = vcmp.lt.f32.partialorder %v199_v56, 0.0004427343 }
  0x68   :  { %v202_v34 = vadd.f32 1.0, %v310_v30  ;;  %v205_v45 = vmul.f32 -0.5, %v310_v30  ;;  %v208_v4 = vand.u32 2147483647, %v310_v30 }
  0x69   :  { %v198_v2 = vmul.f32 %v308_v28, %v197_v49 }
  0x6a   :  { %317 = vlog2.f32 %v202_v34  ;;  %v206_v63 = vadd.f32 1.0, %v205_v45  ;;  %vm209_vm14 = vcmp.lt.f32.partialorder %v208_v4, 0.0004427343 }
  0x6c   :  { %v207_v11 = vmul.f32 %v310_v30, %v206_v63 }
  0x70   :  { %v312_v52 = vpop.eup %311 }
  0x71   :  { %v314_v57 = vpop.eup %313  ;;  %v177_v59 = vmul.f32 0.6931472, %v312_v52 }
  0x72   :  { %v186_v62 = vmul.f32 0.6931472, %v314_v57 }
  0x73   :  { %v183_v0 = vsel %vm510_vm8, %v180_v48, %v177_v59 }
  0x74   :  { %v316_v5 = vpop.eup %315  ;;  %v192_v3 = vsel %vm515_vm9, %v189_v55, %v186_v62  ;;  %v211_v7 = vadd.f32 %v183_v0, %v155_v53 }
  0x75   :  { %v195_v8 = vmul.f32 0.6931472, %v316_v5  ;;  %v212_v10 = vadd.f32 %v192_v3, %v156_v58 }
  0x76   :  { %v242_v13 = vsel %vm238_vm10, %v211_v7, 0.0 }
  0x77   :  { %v318_v14 = vpop.eup %317  ;;  %v201_v17 = vsel %vm200_vm12, %v198_v2, %v195_v8  ;;  %v243_v18 = vsel %vm239_vm11, %v212_v10, 0.0 }
  0x78   :  { %v204_v19 = vmul.f32 0.6931472, %v318_v14  ;;  %v213_v9 = vadd.f32 %v201_v17, %v157_v6  ;;  %v246_v20 = vadd.f32 %v243_v18, %v242_v13 }
  0x7a   :  { %v210_v21 = vsel %vm209_vm14, %v207_v11, %v204_v19  ;;  %v244_v22 = vsel %vm240_vm13, %v213_v9, 0.0 }
  0x7b   :  { %v214_v23 = vadd.f32 %v210_v21, %v158_v16  ;;  %v247_v24 = vadd.f32 %v246_v20, %v244_v22 }
  0x7d   :  { %v245_v25 = vsel %vm241_vm15, %v214_v23, 0.0 }
  0x7e   :  { %v248_v26 = vadd.f32 %v247_v24, %v245_v25 }
  0x80   :  { %249 = vst [vmem:[#allocation11] sm:$0xff] %v248_v26 }
  0x81   :  { %402 = shalt.err (!%p399_p10)
}
  0x82   :  { %271 = dma.vmem_to_hbm [thread:$0]  %s269_s15, 128, %s534_s5, [#allocation12]  }
  0x83   :  { %417 = dma.done.wait [#allocation5], 512  }
  0x84   :  { %418 = vsyncadd [#allocation5], 4294966784 }
  0x85   :  { %419 = dma.done.wait [#allocation12], 128  }
  0x86   :  { %420 = vsyncadd [#allocation12], 4294967168 }
  0x87   :  { %278 = vsyncpa [#allocation4], 1 }
  0x88   :  { %279 = vsyncpa [#allocation9], 1 }
  0x89   :  { %280 = vsyncpa [#allocation5], 1 }
  0x8a   :  { %281 = vsyncpa [#allocation12], 1 }
  0x8b   :  { %282 = vsyncpa [#allocation6], 1 }

</bundles_post_ra>
